<compile_context>
chip_gen: v6e
topology: v6e:2x2x1
jax: 0.10.0
libtpu: 0.0.40
codegen_flags: <defaults>
</compile_context>

<pallas_src>
import functools

import jax
import jax.numpy as jnp
from jax import lax
from jax.experimental import pallas as pl
from jax.experimental.pallas import tpu as pltpu

EPS = 1e-5


def _linear_relu(x, w_bf16, bias_row):
    """relu(x @ W.T + b): bf16 MXU operands, f32 accumulation.

    W stays in its PyTorch (out, in) layout -- contract dim 1 of both operands,
    so no host-side transpose pass is needed.
    """
    h = lax.dot_general(
        x.astype(jnp.bfloat16), w_bf16,
        dimension_numbers=(((1,), (1,)), ((), ())),
        preferred_element_type=jnp.float32)
    return jnp.maximum(h + bias_row, 0.0)


# --------------------------- single-pass kernel ----------------------------
def _single_pass_kernel(x_ref, w_ref, p_ref, o_ref, *, inv_batch):
    x = x_ref[...]                                             # (B, Hp) f32
    h = _linear_relu(x, w_ref[...], p_ref[0:1, :])             # (B, Hp) f32
    mean = jnp.sum(h, axis=0, keepdims=True) * inv_batch
    var = jnp.maximum(
        jnp.sum(h * h, axis=0, keepdims=True) * inv_batch - mean * mean, 0.0)
    scale = p_ref[1:2, :] * lax.rsqrt(var + EPS)               # gamma folded in
    shift = p_ref[2:3, :] - mean * scale
    o_ref[...] = x + h * scale + shift


# --------------------------- two-phase tiled kernel -------------------------
def _two_phase_kernel(x_ref, w_ref, p_ref, o_ref, stats_ref, *h_stash,
                      inv_batch, stash_h):
    phase = pl.program_id(0)   # 0: accumulate batch stats, 1: normalize+write
    tile = pl.program_id(1)
    h_ref = h_stash[0] if stash_h else None

    @pl.when(phase == 0)
    def _accumulate_stats():
        h = _linear_relu(x_ref[...], w_ref[...], p_ref[0:1, :])

        @pl.when(tile == 0)
        def _init():
            stats_ref[...] = jnp.zeros_like(stats_ref)

        # Fused update: single (2, Hp) RMW for sum and sum-of-squares.
        upd = jnp.concatenate(
            [jnp.sum(h, axis=0, keepdims=True),
             jnp.sum(h * h, axis=0, keepdims=True)], axis=0)
        stats_ref[0:2, :] += upd

        if stash_h:
            h_ref[tile] = h.astype(h_ref.dtype)
        # NOTE: no output write here -- the output index_map keeps the block
        # index fixed at (0, 0) for the whole of phase 0, so no garbage block
        # is ever written back to HBM.

    @pl.when(phase == 1)
    def _normalize():
        @pl.when(tile == 0)
        def _finalize_stats():
            mean = stats_ref[0:1, :] * inv_batch
            var = jnp.maximum(
                stats_ref[1:2, :] * inv_batch - mean * mean, 0.0)
            scale = p_ref[1:2, :] * lax.rsqrt(var + EPS)
            stats_ref[2:3, :] = scale                       # cached scale
            stats_ref[3:4, :] = p_ref[2:3, :] - mean * scale  # cached shift

        x = x_ref[...]
        if stash_h:
            h = h_ref[tile].astype(jnp.float32)
        else:
            h = _linear_relu(x, w_ref[...], p_ref[0:1, :])
        o_ref[...] = x + h * stats_ref[2:3, :] + stats_ref[3:4, :]


# ------------------------------- wrapper ------------------------------------
def _vmem_capacity_bytes():
    try:
        return int(pltpu.get_tpu_info().vmem_capacity_bytes)
    except Exception:
        return 64 * 1024 * 1024   # conservative (v7x per-TC VMEM)


def _pick_batch_tile(batch, hp, budget):
    """Largest sublane-aligned divisor of batch, VMEM-budget capped."""
    if batch % 8 != 0:
        return batch              # single full-dim tile (always legal)
    # Keep ~6 per-tile (tb, hp) f32 buffers (double-buffered x/out + working
    # registers) well inside the budget.
    cap = max(8, budget // max(1, 6 * hp * 4))
    for cand in (1024, 512, 256, 128, 64, 32, 16, 8):
        if cand <= min(batch, cap) and batch % cand == 0:
            return cand
    return batch


def resblock_forward(x, weight, bias, gamma, beta, *, path="auto",
                     batch_tile=None, stash=None, stash_dtype=jnp.float32):
    """x: (B, H) f32; weight: (H, H) in PyTorch (out, in) layout."""
    B, H = x.shape
    Hp = ((H + 127) // 128) * 128              # lane-dense feature axis
    if Hp != H:
        pad = Hp - H
        # Zero padding is exact: padded features give h == 0 and gamma/beta
        # == 0, so bn == 0 and the residual contribution is 0; sliced below.
        x = jnp.pad(x, ((0, 0), (0, pad)))
        weight = jnp.pad(weight, ((0, pad), (0, pad)))
        bias = jnp.pad(bias, (0, pad))
        gamma = jnp.pad(gamma, (0, pad))
        beta = jnp.pad(beta, (0, pad))

    # Host-side bf16 weight: one cast instead of one per grid step, and half
    # the HBM / VMEM footprint for W.
    w_bf16 = weight.astype(jnp.bfloat16)                       # (Hp, Hp)
    params = jnp.stack([bias, gamma, beta], axis=0)            # (3, Hp) f32

    cap = _vmem_capacity_bytes()
    budget = int(0.45 * cap)     # leave headroom for double-buffers / compiler

    # Rough single-pass residency: x + out + h (f32) + bf16 W + params.
    single_need = 3 * B * Hp * 4 + Hp * Hp * 2 + 64 * Hp
    if path == "auto":
        path = "single" if single_need <= budget else "tiled"

    if path == "single":
        kernel = functools.partial(_single_pass_kernel, inv_batch=1.0 / B)
        out = pl.pallas_call(
            kernel,
            out_shape=jax.ShapeDtypeStruct((B, Hp), jnp.float32),
            grid=(1,),
            in_specs=[
                pl.BlockSpec((B, Hp), lambda i: (0, 0)),       # x
                pl.BlockSpec((Hp, Hp), lambda i: (0, 0)),      # W (bf16)
                pl.BlockSpec((3, Hp), lambda i: (0, 0)),       # bias/gamma/beta
            ],
            out_specs=pl.BlockSpec((B, Hp), lambda i: (0, 0)),
            compiler_params=pltpu.CompilerParams(
                dimension_semantics=("arbitrary",),
                vmem_limit_bytes=int(min(cap, max(32 << 20, 2 * single_need))),
            ),
        )(x, w_bf16, params)
        return out[:, :H] if Hp != H else out

    # ---------------- two-phase tiled path ----------------
    tb = batch_tile if batch_tile is not None else _pick_batch_tile(B, Hp, budget)
    assert B % tb == 0, "batch_tile must divide the batch size"
    assert tb == B or tb % 8 == 0, "batch tile must be sublane-aligned"
    n_tiles = B // tb

    stash_bytes = B * Hp * jnp.dtype(stash_dtype).itemsize
    tiled_base = Hp * Hp * 2 + 4 * tb * Hp * 4 + 8 * Hp * 4
    if stash is None:
        # v7x (64 MiB VMEM) gets a smaller budget automatically via `cap`;
        # using bf16 for stash_dtype doubles the B*Hp range that fits.
        stash = (stash_bytes + tiled_base) <= budget
    tiled_need = tiled_base + (stash_bytes if stash else 0)

    kernel = functools.partial(_two_phase_kernel, inv_batch=1.0 / B,
                               stash_h=stash)
    scratch_shapes = [pltpu.VMEM((4, Hp), jnp.float32)]  # sum/sumsq/scale/shift
    if stash:
        scratch_shapes.append(pltpu.VMEM((n_tiles, tb, Hp), stash_dtype))

    out = pl.pallas_call(
        kernel,
        out_shape=jax.ShapeDtypeStruct((B, Hp), jnp.float32),
        grid=(2, n_tiles),                                     # (phase, tile)
        in_specs=[
            pl.BlockSpec((tb, Hp), lambda p, t: (t, 0)),       # x: streamed
            pl.BlockSpec((Hp, Hp), lambda p, t: (0, 0)),       # W: resident
            pl.BlockSpec((3, Hp), lambda p, t: (0, 0)),        # params: resident
        ],
        # Phase 0 pins the output block to (0, 0) -> it never changes, so no
        # placeholder writeback; phase 1 walks the blocks and writes each once.
        out_specs=pl.BlockSpec((tb, Hp), lambda p, t: (p * t, 0)),
        scratch_shapes=scratch_shapes,
        compiler_params=pltpu.CompilerParams(
            # Shared stats scratch + phase ordering => both axes sequential.
            dimension_semantics=("arbitrary", "arbitrary"),
            vmem_limit_bytes=int(min(cap, max(32 << 20, 2 * tiled_need))),
        ),
    )(x, w_bf16, params)

    return out[:, :H] if Hp != H else out


def resblock_reference(x, weight, bias, gamma, beta):
    # Mirrors the kernel's bf16 MXU operands (f32 accumulation) so the check
    # isolates kernel correctness from bf16 quantization of the linear layer.
    h = lax.dot_general(
        x.astype(jnp.bfloat16), weight.astype(jnp.bfloat16),
        dimension_numbers=(((1,), (1,)), ((), ())),
        preferred_element_type=jnp.float32)
    h = jnp.maximum(h + bias[None, :], 0.0)
    mean = jnp.mean(h, axis=0, keepdims=True)
    var = jnp.mean((h - mean) ** 2, axis=0, keepdims=True)
    bn = (h - mean) / jnp.sqrt(var + EPS) * gamma[None, :] + beta[None, :]
    return x + bn


if __name__ == "__main__":
    B, H = 256, 128        # lane-dense hidden dim; small enough for VMEM
    key = jax.random.PRNGKey(0)
    kx, kw, kb, kg, kbt = jax.random.split(key, 5)

    x = jax.random.normal(kx, (B, H), dtype=jnp.float32)
    bound = 1.0 / jnp.sqrt(jnp.float32(H))       # PyTorch Linear init bound
    weight = jax.random.uniform(kw, (H, H), jnp.float32, -bound, bound)
    bias = jax.random.uniform(kb, (H,), jnp.float32, -bound, bound)
    gamma = 1.0 + 0.1 * jax.random.normal(kg, (H,), dtype=jnp.float32)
    beta = 0.1 * jax.random.normal(kbt, (H,), dtype=jnp.float32)

    ref = resblock_reference(x, weight, bias, gamma, beta)

    # Auto path: single-pass, fully VMEM-resident at this size.
    out = jax.block_until_ready(resblock_forward(x, weight, bias, gamma, beta))
    assert out.shape == ref.shape
    assert jnp.allclose(out, ref, atol=1e-3, rtol=1e-3), "single-pass mismatch"

    # Two-phase tiled path with the VMEM h-stash (big-batch fast path).
    out_t = jax.block_until_ready(
        resblock_forward(x, weight, bias, gamma, beta,
                         path="tiled", batch_tile=64, stash=True))
    assert jnp.allclose(out_t, ref, atol=1e-3, rtol=1e-3), "stash path mismatch"

    # Two-phase fallback without the stash (recompute in phase 1).
    out_r = jax.block_until_ready(
        resblock_forward(x, weight, bias, gamma, beta,
                         path="tiled", batch_tile=128, stash=False))
    assert jnp.allclose(out_r, ref, atol=1e-3, rtol=1e-3), "recompute mismatch"

    print("KERNEL_OK")
</pallas_src>

<mosaic_0001>
module attributes {stable_mosaic.version = 11 : i64} {
  func.func @_single_pass_kernel(%arg0: i32, %arg1: memref<256x128xf32, #tpu.memory_space<vmem>>, %arg2: memref<128x128xbf16, #tpu.memory_space<vmem>>, %arg3: memref<3x128xf32, #tpu.memory_space<vmem>>, %arg4: memref<256x128xf32, #tpu.memory_space<vmem>>) attributes {dimension_semantics = [#tpu.dimension_semantics<arbitrary>], iteration_bounds = array<i64: 1>, scalar_prefetch = 0 : i64, scratch_operands = 0 : i64, tpu.core_type = #tpu.core_type<tc>, window_params = [{pipeline_mode = #tpu.pipeline_mode<synchronous>, transform_indices = @transform_0, window_bounds = array<i64: 256, 128>}, {pipeline_mode = #tpu.pipeline_mode<synchronous>, transform_indices = @transform_1, window_bounds = array<i64: 128, 128>}, {pipeline_mode = #tpu.pipeline_mode<synchronous>, transform_indices = @transform_2, window_bounds = array<i64: 3, 128>}, {pipeline_mode = #tpu.pipeline_mode<synchronous>, transform_indices = @transform_3, window_bounds = array<i64: 256, 128>}]} {
    %c0 = arith.constant 0 : index
    %c0_0 = arith.constant 0 : index
    %0 = vector.load %arg1[%c0, %c0_0] : memref<256x128xf32, #tpu.memory_space<vmem>>, vector<256x128xf32>
    %c0_1 = arith.constant 0 : index
    %c0_2 = arith.constant 0 : index
    %1 = vector.load %arg2[%c0_1, %c0_2] : memref<128x128xbf16, #tpu.memory_space<vmem>>, vector<128x128xbf16>
    %c0_3 = arith.constant 0 : index
    %c0_4 = arith.constant 0 : index
    %2 = vector.load %arg3[%c0_3, %c0_4] : memref<3x128xf32, #tpu.memory_space<vmem>>, vector<1x128xf32>
    %3 = arith.truncf %0 : vector<256x128xf32> to vector<256x128xbf16>
    %cst = arith.constant dense<0.000000e+00> : vector<256x128xf32>
    %4 = tpu.matmul %3, %1, %cst {dimension_numbers = #tpu.dot_dimension_numbers<[1], [1], [0], [0], [0, 0, 1, 0], [], []>} : vector<256x128xbf16>, vector<128x128xbf16>, vector<256x128xf32> -> vector<256x128xf32>
    %5 = vector.broadcast %2 : vector<1x128xf32> to vector<256x128xf32>
    %6 = arith.addf %4, %5 : vector<256x128xf32>
    %cst_5 = arith.constant 0.000000e+00 : f32
    %7 = vector.broadcast %cst_5 : f32 to vector<256x128xf32>
    %8 = arith.maximumf %6, %7 : vector<256x128xf32>
    %cst_6 = arith.constant dense<0.000000e+00> : vector<128xf32>
    %9 = vector.multi_reduction <add>, %8, %cst_6 [0] : vector<256x128xf32> to vector<128xf32>
    %10 = vector.shape_cast %9 : vector<128xf32> to vector<1x128xf32>
    %cst_7 = arith.constant 3.906250e-03 : f32
    %11 = vector.broadcast %cst_7 : f32 to vector<1x128xf32>
    %12 = arith.mulf %10, %11 : vector<1x128xf32>
    %13 = arith.mulf %8, %8 : vector<256x128xf32>
    %cst_8 = arith.constant dense<0.000000e+00> : vector<128xf32>
    %14 = vector.multi_reduction <add>, %13, %cst_8 [0] : vector<256x128xf32> to vector<128xf32>
    %15 = vector.shape_cast %14 : vector<128xf32> to vector<1x128xf32>
    %cst_9 = arith.constant 3.906250e-03 : f32
    %16 = vector.broadcast %cst_9 : f32 to vector<1x128xf32>
    %17 = arith.mulf %15, %16 : vector<1x128xf32>
    %18 = arith.mulf %12, %12 : vector<1x128xf32>
    %19 = arith.subf %17, %18 : vector<1x128xf32>
    %cst_10 = arith.constant 0.000000e+00 : f32
    %20 = vector.broadcast %cst_10 : f32 to vector<1x128xf32>
    %21 = arith.maximumf %19, %20 : vector<1x128xf32>
    %c1 = arith.constant 1 : index
    %c0_11 = arith.constant 0 : index
    %22 = vector.load %arg3[%c1, %c0_11] : memref<3x128xf32, #tpu.memory_space<vmem>>, vector<1x128xf32>
    %cst_12 = arith.constant 9.99999974E-6 : f32
    %23 = vector.broadcast %cst_12 : f32 to vector<1x128xf32>
    %24 = arith.addf %21, %23 : vector<1x128xf32>
    %25 = math.rsqrt %24 : vector<1x128xf32>
    %26 = arith.mulf %22, %25 : vector<1x128xf32>
    %c2 = arith.constant 2 : index
    %c0_13 = arith.constant 0 : index
    %27 = vector.load %arg3[%c2, %c0_13] : memref<3x128xf32, #tpu.memory_space<vmem>>, vector<1x128xf32>
    %28 = arith.mulf %12, %26 : vector<1x128xf32>
    %29 = arith.subf %27, %28 : vector<1x128xf32>
    %30 = vector.broadcast %26 : vector<1x128xf32> to vector<256x128xf32>
    %31 = arith.mulf %8, %30 : vector<256x128xf32>
    %32 = arith.addf %0, %31 : vector<256x128xf32>
    %33 = vector.broadcast %29 : vector<1x128xf32> to vector<256x128xf32>
    %34 = arith.addf %32, %33 : vector<256x128xf32>
    %c0_14 = arith.constant 0 : index
    %c0_15 = arith.constant 0 : index
    %35 = vector.load %arg4[%c0_14, %c0_15] : memref<256x128xf32, #tpu.memory_space<vmem>>, vector<256x128xf32>
    tpu.vector_store %arg4[%c0_14, %c0_15], %34 {strides = array<i32>} : memref<256x128xf32, #tpu.memory_space<vmem>>, vector<256x128xf32>,
    return
  }
  func.func @transform_0(%arg0: i32) -> (i32, i32) {
    %c0_i32 = arith.constant 0 : i32
    %c0_i32_0 = arith.constant 0 : i32
    %c0_i32_1 = arith.constant 0 : i32
    return %c0_i32, %c0_i32_0 : i32, i32
  }
  func.func @transform_1(%arg0: i32) -> (i32, i32) {
    %c0_i32 = arith.constant 0 : i32
    %c0_i32_0 = arith.constant 0 : i32
    %c0_i32_1 = arith.constant 0 : i32
    return %c0_i32, %c0_i32_0 : i32, i32
  }
  func.func @transform_2(%arg0: i32) -> (i32, i32) {
    %c0_i32 = arith.constant 0 : i32
    %c0_i32_0 = arith.constant 0 : i32
    %c0_i32_1 = arith.constant 0 : i32
    return %c0_i32, %c0_i32_0 : i32, i32
  }
  func.func @transform_3(%arg0: i32) -> (i32, i32) {
    %c0_i32 = arith.constant 0 : i32
    %c0_i32_0 = arith.constant 0 : i32
    %c0_i32_1 = arith.constant 0 : i32
    return %c0_i32, %c0_i32_0 : i32, i32
  }
}

</mosaic_0001>

<bundles_post_ra>
// kernel: tpu_custom_call.1
= control target key start
LH: loop header
LB: loop body
LE: loop exit
PB: predicated region body
PF: predicated region fallthrough
CT: control target
= control target key end

     0   :  { %8 = vsyncpa [#allocation3], 0  ;;  %s1290_s0 = inlined_call_operand.hbm [shape: f32[256,128], index: 0, kind: input, shape index: {}]   ;;  %s1291_s1 = inlined_call_operand.hbm [shape: bf16[128,128], index: 1, kind: input, shape index: {}]   ;;  %s1292_s2 = inlined_call_operand.hbm [shape: f32[3,128], index: 2, kind: input, shape index: {}]   ;;  %s1293_s3 = inlined_call_operand.hbm [shape: f32[256,128], index: 3, kind: output, shape index: {}]  }
   0x1   :  { %9 = vsyncpa [#allocation6], 0 }
   0x2   :  { %10 = vsyncpa [#allocation4], 0  ;;  %s838_s12 = smov [#allocation5]  }
   0x3   :  { %s28_s13 = sshll.u32 %s838_s12, 4  ;;  %s29_s13 = int_to_ptr.vmem [resolvable:$true] %s28_s13 }
   0x4   :  { %s760_s14 = scalar_lea.vmem %s29_s13, 1024  ;;  %p765_p1 = scmp.lt.s32.totalorder %s29_s13, %s29_s13 }
   0x5   :  { %p761_p0 = scmp.ne.s32.totalorder %s29_s13, %s760_s14  ;;  %p766_p2 = scmp.lt.s32.totalorder %s760_s14, %s760_s14 }
   0x7   :  { %p767_p3 = por %p766_p2, %p765_p1 }
   0x9   :  { %p768_p4 = pnand %p767_p3, %p761_p0 }
   0xb   :  { %771 = shalt.err (!%p768_p4)
}
   0xc   :  { %s839_s15 = smov 64   ;;  %s840_s16 = smov 4  }
   0xd   :  { %34 = dma.hbm_to_vmem [thread:$0]  %s1291_s1, 1024, %s29_s13, [#allocation6], %s839_s15, %s839_s15, %s840_s16  }
   0xe   :  { %s841_s19 = smov [#allocation2]  }
   0xf   :  { %s16_s20 = sshll.u32 %s841_s19, 4  ;;  %s17_s20 = int_to_ptr.vmem [resolvable:$true] %s16_s20 }
  0x10   :  { %s780_s21 = scalar_lea.vmem %s17_s20, 4096  ;;  %p785_p6 = scmp.lt.s32.totalorder %s17_s20, %s17_s20 }
  0x11   :  { %p781_p5 = scmp.ne.s32.totalorder %s17_s20, %s780_s21  ;;  %p786_p7 = scmp.lt.s32.totalorder %s780_s21, %s780_s21 }
  0x13   :  { %p787_p8 = por %p786_p7, %p785_p6 }
  0x15   :  { %p788_p9 = pnand %p787_p8, %p781_p5 }
  0x17   :  { %791 = shalt.err (!%p788_p9)
}
  0x18   :  { %s842_s22 = smov 128   ;;  %s843_s23 = smov 8  }
  0x19   :  { %22 = dma.hbm_to_vmem [thread:$0]  %s1290_s0, 4096, %s17_s20, [#allocation3], %s842_s22, %s842_s22, %s843_s23  }
  0x1a   :  { %s844_s1 = smov [#allocation7]  }
  0x1b   :  { %s41_s26 = sshll.u32 %s844_s1, 4  ;;  %s42_s26 = int_to_ptr.vmem [resolvable:$true] %s41_s26 }
  0x1c   :  { %s800_s27 = scalar_lea.vmem %s42_s26, 64  ;;  %p805_p11 = scmp.lt.s32.totalorder %s42_s26, %s42_s26 }
  0x1d   :  { %p801_p10 = scmp.ne.s32.totalorder %s42_s26, %s800_s27  ;;  %p806_p12 = scmp.lt.s32.totalorder %s800_s27, %s800_s27 }
  0x1f   :  { %p807_p13 = por %p806_p12, %p805_p11 }
  0x21   :  { %p808_p0 = pnand %p807_p13, %p801_p10 }
  0x23   :  { %811 = shalt.err (!%p808_p0)
}
  0x24   :  { %44 = dma.hbm_to_vmem [thread:$0]  %s1292_s2, 64, %s42_s26, [#allocation6]  }
  0x25   :  { %832 = dma.done.wait [#allocation3], 4096  }
  0x26   :  { %833 = vsyncadd [#allocation3], 4294963200 }
  0x27   :  { %834 = dma.done.wait [#allocation6], 1088  }
  0x28   :  { %835 = vsyncadd [#allocation6], 4294966208  ;;  %v742_v0 = vld [vmem:[#allocation5 + $0x38] sm:$0xff]   ;;  %v743_v1 = vld [vmem:[#allocation5 + $0x30] sm:$0xff]   ;;  %s845_s0 = smov [#allocation8]  }
  0x29   :  { %670 = vmatprep.subr.bf16.mxu0 %v742_v0  ;;  %718 = vmatprep.subr.bf16.mxu1 %v742_v0  ;;  %v744_v2 = vld [vmem:[#allocation5 + $0x28] sm:$0xff]   ;;  %v878_v3 = vld [vmem:[#allocation2] sm:$0xff]  ;;  %v746_v10 = vld [vmem:[#allocation5 + $0x18] sm:$0xff]   ;;  %s624_s2 = sshll.u32 %s845_s0, 4  ;;  %s625_s2 = int_to_ptr.vmem [resolvable:$true] %s624_s2 }
  0x2a   :  { %671 = vmatpush3.bf16.xpose.msra.mxu0 %v742_v0  ;;  %726 = vmatpush3.bf16.xpose.msra.mxu1 %v742_v0  ;;  %v880_v4 = vld [vmem:[#allocation2 + $0x8] sm:$0xff]  ;;  %v884_v6 = vld [vmem:[#allocation2 + $0x80] sm:$0xff]  ;;  %v747_v11 = vld [vmem:[#allocation5 + $0x10] sm:$0xff]   ;;  %s812_s30 = scalar_lea.vmem %s625_s2, 4096  ;;  %p817_p2 = scmp.lt.s32.totalorder %s625_s2, %s625_s2 }
  0x2b   :  { %672 = vmatprep.subr.bf16.mxu0 %v743_v1  ;;  %719 = vmatprep.subr.bf16.mxu1 %v743_v1  ;;  %v104_v5 = vpack.c.bf16 %v880_v4, %v878_v3  ;;  %1318 = vst [vmem:[#allocation12_spill] sm:$0xff] %v884_v6  ;;  %v886_v7 = vld [vmem:[#allocation2 + $0x88] sm:$0xff]  ;;  %v745_v9 = vld [vmem:[#allocation5 + $0x20] sm:$0xff]   ;;  %v890_v14 = vld [vmem:[#allocation2 + $0x10] sm:$0xff]  ;;  %p813_p1 = scmp.ne.s32.totalorder %s625_s2, %s812_s30  ;;  %p818_p3 = scmp.lt.s32.totalorder %s812_s30, %s812_s30 }
  0x2c   :  { %1319 = vst [vmem:[#allocation13_spill] sm:$0xff] %v886_v7  ;;  %v112_v8 = vpack.c.bf16 %v886_v7, %v884_v6  ;;  %v748_v12 = vld [vmem:[#allocation5 + $0x8] sm:$0xff]   ;;  %v749_v13 = vld [vmem:[#allocation5] sm:$0xff]   ;;  %v892_v15 = vld [vmem:[#allocation2 + $0x18] sm:$0xff] }
  0x2d   :  { %686 = vmatprep.mubr.bf16.mxu0 %v104_v5  ;;  %v894_v16 = vld [vmem:[#allocation2 + $0x20] sm:$0xff]  ;;  %v896_v17 = vld [vmem:[#allocation2 + $0x90] sm:$0xff]  ;;  %v898_v18 = vld [vmem:[#allocation2 + $0x98] sm:$0xff]  ;;  %v105_v22 = vpack.c.bf16 %v892_v15, %v890_v14  ;;  %p819_p4 = por %p818_p3, %p817_p2 }
  0x2e   :  { %702 = vmatprep.mubr.bf16.mxu1 %v112_v8  ;;  %1320 = vst [vmem:[#allocation14_spill] sm:$0xff] %v896_v17  ;;  %1321 = vst [vmem:[#allocation15_spill] sm:$0xff] %v898_v18  ;;  %v900_v19 = vld [vmem:[#allocation2 + $0x28] sm:$0xff]  ;;  %v902_v20 = vld [vmem:[#allocation2 + $0xa0] sm:$0xff]  ;;  %v113_v23 = vpack.c.bf16 %v898_v18, %v896_v17 }
  0x2f   :  { %1322 = vst [vmem:[#allocation16_spill] sm:$0xff] %v902_v20  ;;  %v904_v21 = vld [vmem:[#allocation2 + $0xa8] sm:$0xff]  ;;  %v106_v24 = vpack.c.bf16 %v900_v19, %v894_v16  ;;  %v914_v26 = vld [vmem:[#allocation2 + $0x30] sm:$0xff]  ;;  %v916_v27 = vld [vmem:[#allocation2 + $0x38] sm:$0xff]  ;;  %p820_p5 = pnand %p819_p4, %p813_p1 }
  0x30   :  { %1323 = vst [vmem:[#allocation17_spill] sm:$0xff] %v904_v21  ;;  %v114_v25 = vpack.c.bf16 %v904_v21, %v902_v20  ;;  %1324 = vst [vmem:[#allocation18_spill] sm:$0xff] %v916_v27  ;;  %v918_v28 = vld [vmem:[#allocation2 + $0x40] sm:$0xff]  ;;  %v920_v29 = vld [vmem:[#allocation2 + $0xb0] sm:$0xff]  ;;  %v107_v34 = vpack.c.bf16 %v916_v27, %v914_v26 }
  0x31   :  { %1325 = vst [vmem:[#allocation19_spill] sm:$0xff] %v918_v28  ;;  %1326 = vst [vmem:[#allocation20_spill] sm:$0xff] %v920_v29  ;;  %v922_v30 = vld [vmem:[#allocation2 + $0xb8] sm:$0xff]  ;;  %v924_v31 = vld [vmem:[#allocation2 + $0x48] sm:$0xff] }
  0x32   :  { %673 = vmatpush3.bf16.xpose.msra.mxu0 %v743_v1  ;;  %727 = vmatpush3.bf16.xpose.msra.mxu1 %v743_v1  ;;  %1327 = vst [vmem:[#allocation21_spill] sm:$0xff] %v922_v30  ;;  %1328 = vst [vmem:[#allocation22_spill] sm:$0xff] %v924_v31  ;;  %v926_v32 = vld [vmem:[#allocation2 + $0xc0] sm:$0xff]  ;;  %v928_v33 = vld [vmem:[#allocation2 + $0xc8] sm:$0xff]  ;;  %v115_v35 = vpack.c.bf16 %v922_v30, %v920_v29  ;;  %v108_v36 = vpack.c.bf16 %v924_v31, %v918_v28 }
  0x33   :  { %674 = vmatprep.subr.bf16.mxu0 %v744_v2  ;;  %720 = vmatprep.subr.bf16.mxu1 %v744_v2  ;;  %1329 = vst [vmem:[#allocation23_spill] sm:$0xff] %v926_v32  ;;  %1330 = vst [vmem:[#allocation24_spill] sm:$0xff] %v928_v33  ;;  %v116_v37 = vpack.c.bf16 %v928_v33, %v926_v32  ;;  %v938_v38 = vld [vmem:[#allocation2 + $0x50] sm:$0xff]  ;;  %v940_v39 = vld [vmem:[#allocation2 + $0x58] sm:$0xff] }
  0x34   :  { %1331 = vst [vmem:[#allocation25_spill] sm:$0xff] %v938_v38  ;;  %1332 = vst [vmem:[#allocation26_spill] sm:$0xff] %v940_v39  ;;  %v942_v40 = vld [vmem:[#allocation2 + $0x60] sm:$0xff]  ;;  %v944_v41 = vld [vmem:[#allocation2 + $0xd0] sm:$0xff]  ;;  %v109_v46 = vpack.c.bf16 %v940_v39, %v938_v38 }
  0x35   :  { %1333 = vst [vmem:[#allocation27_spill] sm:$0xff] %v942_v40  ;;  %1334 = vst [vmem:[#allocation28_spill] sm:$0xff] %v944_v41  ;;  %v946_v42 = vld [vmem:[#allocation2 + $0xd8] sm:$0xff]  ;;  %v948_v43 = vld [vmem:[#allocation2 + $0x68] sm:$0xff] }
  0x36   :  { %1335 = vst [vmem:[#allocation29_spill] sm:$0xff] %v946_v42  ;;  %1336 = vst [vmem:[#allocation30_spill] sm:$0xff] %v948_v43  ;;  %v950_v44 = vld [vmem:[#allocation2 + $0xe0] sm:$0xff]  ;;  %v952_v45 = vld [vmem:[#allocation2 + $0xe8] sm:$0xff]  ;;  %v117_v47 = vpack.c.bf16 %v946_v42, %v944_v41  ;;  %v110_v48 = vpack.c.bf16 %v948_v43, %v942_v40 }
  0x37   :  { %1337 = vst [vmem:[#allocation31_spill] sm:$0xff] %v950_v44  ;;  %v118_v49 = vpack.c.bf16 %v952_v45, %v950_v44  ;;  %v962_v50 = vld [vmem:[#allocation2 + $0x70] sm:$0xff]  ;;  %v964_v51 = vld [vmem:[#allocation2 + $0x78] sm:$0xff]  ;;  %v976_v58 = vld [vmem:[#allocation7] ss:$0 sm:$0xff] }
  0x38   :  { %1338 = vst [vmem:[#allocation32_spill] sm:$0xff] %v962_v50  ;;  %1339 = vst [vmem:[#allocation33_spill] sm:$0xff] %v964_v51  ;;  %v966_v52 = vld [vmem:[#allocation2 + $0xf0] sm:$0xff]  ;;  %v968_v53 = vld [vmem:[#allocation2 + $0xf8] sm:$0xff]  ;;  %v111_v54 = vpack.c.bf16 %v964_v51, %v962_v50 }
  0x39   :  { %1340 = vst [vmem:[#allocation34_spill] sm:$0xff] %v966_v52  ;;  %1341 = vst [vmem:[#allocation35_spill] sm:$0xff] %v968_v53  ;;  %v119_v55 = vpack.c.bf16 %v968_v53, %v966_v52 }
  0x3a   :  { %675 = vmatpush3.bf16.xpose.msra.mxu0 %v744_v2  ;;  %728 = vmatpush3.bf16.xpose.msra.mxu1 %v744_v2 }
  0x3b   :  { %676 = vmatprep.subr.bf16.mxu0 %v745_v9  ;;  %721 = vmatprep.subr.bf16.mxu1 %v745_v9 }
  0x42   :  { %677 = vmatpush3.bf16.xpose.msra.mxu0 %v745_v9  ;;  %729 = vmatpush3.bf16.xpose.msra.mxu1 %v745_v9 }
  0x43   :  { %678 = vmatprep.subr.bf16.mxu0 %v746_v10  ;;  %722 = vmatprep.subr.bf16.mxu1 %v746_v10 }
  0x4a   :  { %679 = vmatpush3.bf16.xpose.msra.mxu0 %v746_v10  ;;  %730 = vmatpush3.bf16.xpose.msra.mxu1 %v746_v10 }
  0x4b   :  { %680 = vmatprep.subr.bf16.mxu0 %v747_v11  ;;  %723 = vmatprep.subr.bf16.mxu1 %v747_v11 }
  0x52   :  { %681 = vmatpush3.bf16.xpose.msra.mxu0 %v747_v11  ;;  %731 = vmatpush3.bf16.xpose.msra.mxu1 %v747_v11 }
  0x53   :  { %682 = vmatprep.subr.bf16.mxu0 %v748_v12  ;;  %724 = vmatprep.subr.bf16.mxu1 %v748_v12 }
  0x5a   :  { %683 = vmatpush3.bf16.xpose.msra.mxu0 %v748_v12  ;;  %732 = vmatpush3.bf16.xpose.msra.mxu1 %v748_v12 }
  0x5b   :  { %684 = vmatprep.subr.bf16.mxu0 %v749_v13  ;;  %725 = vmatprep.subr.bf16.mxu1 %v749_v13 }
  0x62   :  { %685 = vmatpush3.bf16.xpose.msra.mxu0 %v749_v13  ;;  %733 = vmatpush3.bf16.xpose.msra.mxu1 %v749_v13 }
  0x69   :  { %687 = vmatmul.mubr.bf16.vlgmr.msra.gmra.mxu0 %v105_v22  ;;  %703 = vmatmul.mubr.bf16.vlgmr.msra.gmra.mxu1 %v113_v23 }
  0x6a   :  { %690 = vmatprep.mubr.bf16.mxu0 %v106_v24  ;;  %706 = vmatprep.mubr.bf16.mxu1 %v114_v25 }
  0x71   :  { %691 = vmatmul.mubr.bf16.gmra.mxu0 %v107_v34  ;;  %707 = vmatmul.mubr.bf16.gmra.mxu1 %v115_v35 }
  0x72   :  { %694 = vmatprep.mubr.bf16.mxu0 %v108_v36  ;;  %710 = vmatprep.mubr.bf16.mxu1 %v116_v37 }
  0x79   :  { %695 = vmatmul.mubr.bf16.gmra.mxu0 %v109_v46  ;;  %711 = vmatmul.mubr.bf16.gmra.mxu1 %v117_v47 }
  0x7a   :  { %698 = vmatprep.mubr.bf16.mxu0 %v110_v48  ;;  %714 = vmatprep.mubr.bf16.mxu1 %v118_v49 }
  0x81   :  { %699 = vmatmul.mubr.bf16.gmra.mxu0 %v111_v54  ;;  %715 = vmatmul.mubr.bf16.gmra.mxu1 %v119_v55 }
 0x129   :  { %v688_v56 = vpop.f32.mrf.mxu0  ;;  %v974_v57 = vpop.f32.mrf.mxu1 }
 0x12a   :  { %v215_v63 = vadd.f32 %v688_v56, %v976_v58 }
 0x12b   :  { %v206_v59 = vpop.f32.mrf.mxu0  ;;  %v978_v60 = vpop.f32.mrf.mxu1 }
 0x12c   :  { %v207_v61 = vadd.f32 %v976_v58, %v206_v59  ;;  %v988_v10 = vmax.f32 %v215_v63, 0.0 }
 0x12d   :  { %v689_v62 = vpop.f32.mrf.mxu0  ;;  %v982_v0 = vpop.f32.mrf.mxu1 }
 0x12e   :  { %v218_v1 = vadd.f32 %v689_v62, %v976_v58  ;;  %v985_v5 = vmax.f32 %v207_v61, 0.0  ;;  %v405_v37 = vmul.f32 %v988_v10, %v988_v10 }
 0x12f   :  { %v209_v2 = vpop.f32.mrf.mxu0  ;;  %v992_v12 = vpop.f32.mrf.mxu1 }
 0x130   :  { %v210_v8 = vadd.f32 %v976_v58, %v209_v2  ;;  %v994_v13 = vmax.f32 %v218_v1, 0.0  ;;  %v403_v23 = vmul.f32 %v985_v5, %v985_v5 }
 0x131   :  { %v692_v9 = vpop.f32.mrf.mxu0  ;;  %v1009_v49 = vpop.f32.mrf.mxu1 }
 0x132   :  { %v990_v11 = vmax.f32 %v210_v8, 0.0  ;;  %v231_v35 = vadd.f32 %v692_v9, %v976_v58  ;;  %v406_v54 = vmul.f32 %v994_v13, %v994_v13 }
 0x133   :  { %v222_v22 = vpop.f32.mrf.mxu0 }
 0x134   :  { %v365_v24 = vadd.f32 %v990_v11, %v985_v5  ;;  %v404_v25 = vmul.f32 %v990_v11, %v990_v11  ;;  %v223_v34 = vadd.f32 %v976_v58, %v222_v22  ;;  %v1016_v63 = vmax.f32 %v231_v35, 0.0 }
 0x135   :  { %v693_v36 = vpop.f32.mrf.mxu0 }
 0x136   :  { %v366_v46 = vadd.f32 %v365_v24, %v988_v10  ;;  %v435_v47 = vadd.f32 %v404_v25, %v403_v23  ;;  %v1007_v48 = vmax.f32 %v223_v34, 0.0  ;;  %v234_v61 = vadd.f32 %v693_v36, %v976_v58  ;;  %v1023_v23 = vpop.f32.mrf.mxu1 }
 0x137   :  { %v225_v55 = vpop.f32.mrf.mxu0 }
 0x138   :  { %v436_v56 = vadd.f32 %v435_v47, %v405_v37  ;;  %v367_v59 = vadd.f32 %v366_v46, %v994_v13  ;;  %v226_v62 = vadd.f32 %v976_v58, %v225_v55  ;;  %v407_v8 = vmul.f32 %v1007_v48, %v1007_v48 }
 0x139   :  { %v696_v1 = vpop.f32.mrf.mxu0  ;;  %v1025_v34 = vmax.f32 %v234_v61, 0.0 }
 0x13a   :  { %v368_v2 = vadd.f32 %v367_v59, %v1007_v48  ;;  %v437_v9 = vadd.f32 %v436_v56, %v406_v54  ;;  %v1021_v22 = vmax.f32 %v226_v62, 0.0  ;;  %v247_v37 = vadd.f32 %v696_v1, %v976_v58  ;;  %v1035_v59 = vpop.f32.mrf.mxu1 }
 0x13b   :  { %v238_v24 = vpop.f32.mrf.mxu0  ;;  %v409_v54 = vmul.f32 %v1016_v63, %v1016_v63 }
 0x13c   :  { %v438_v25 = vadd.f32 %v437_v9, %v407_v8  ;;  %v369_v36 = vadd.f32 %v368_v2, %v1021_v22  ;;  %v408_v35 = vmul.f32 %v1021_v22, %v1021_v22  ;;  %v239_v46 = vadd.f32 %v976_v58, %v238_v24 }
 0x13d   :  { %v697_v47 = vpop.f32.mrf.mxu0  ;;  %v410_v8 = vmul.f32 %v1025_v34, %v1025_v34  ;;  %v1044_v53 = vmax.f32 %v247_v37, 0.0 }
 0x13e   :  { %v370_v55 = vadd.f32 %v369_v36, %v1016_v63  ;;  %v439_v56 = vadd.f32 %v438_v25, %v408_v35  ;;  %v1037_v61 = vmax.f32 %v239_v46, 0.0  ;;  %v250_v62 = vadd.f32 %v697_v47, %v976_v58  ;;  %v289_v47 = vpop.f32.mrf.mxu1 }
 0x13f   :  { %v241_v2 = vpop.f32.mrf.mxu0 }
 0x140   :  { %v440_v1 = vadd.f32 %v439_v56, %v409_v54  ;;  %v371_v9 = vadd.f32 %v370_v55, %v1025_v34  ;;  %v242_v24 = vadd.f32 %v976_v58, %v241_v2  ;;  %v411_v36 = vmul.f32 %v1037_v61, %v1037_v61 }
 0x141   :  { %v700_v52 = vpop.f32.mrf.mxu0  ;;  %v1051_v44 = vmax.f32 %v250_v62, 0.0  ;;  %v1062_v62 = vpop.f32.mrf.mxu1 }
 0x142   :  { %v372_v25 = vadd.f32 %v371_v9, %v1037_v61  ;;  %v441_v35 = vadd.f32 %v440_v1, %v410_v8  ;;  %v1049_v46 = vmax.f32 %v242_v24, 0.0  ;;  %v413_v9 = vmul.f32 %v1044_v53, %v1044_v53 }
 0x143   :  { %v254_v42 = vpop.f32.mrf.mxu0 }
 0x144   :  { %v442_v54 = vadd.f32 %v441_v35, %v411_v36  ;;  %v373_v55 = vadd.f32 %v372_v25, %v1049_v46  ;;  %v412_v37 = vmul.f32 %v1049_v46, %v1049_v46  ;;  %v255_v56 = vadd.f32 %v976_v58, %v254_v42 }
 0x145   :  { %v701_v2 = vpop.f32.mrf.mxu0  ;;  %v263_v36 = vadd.f32 %v700_v52, %v976_v58  ;;  %v414_v25 = vmul.f32 %v1051_v44, %v1051_v44  ;;  %v271_v52 = vadd.f32 %v976_v58, %v978_v60 }
 0x146   :  { %v374_v8 = vadd.f32 %v373_v55, %v1044_v53  ;;  %v443_v1 = vadd.f32 %v442_v54, %v412_v37  ;;  %v1060_v24 = vmax.f32 %v255_v56, 0.0  ;;  %v266_v33 = vadd.f32 %v701_v2, %v976_v58  ;;  %v302_v56 = vpop.f32.mrf.mxu1 }
 0x147   :  { %v257_v35 = vpop.f32.mrf.mxu0  ;;  %v1073_v30 = vmax.f32 %v263_v36, 0.0 }
 0x148   :  { %v444_v41 = vadd.f32 %v443_v1, %v413_v9  ;;  %v375_v42 = vadd.f32 %v374_v8, %v1051_v44  ;;  %v258_v32 = vadd.f32 %v976_v58, %v257_v35  ;;  %v415_v54 = vmul.f32 %v1060_v24, %v1060_v24  ;;  %v713_v36 = vpop.f32.mrf.mxu1 }
 0x149   :  { %v1079_v8 = vmax.f32 %v266_v33, 0.0  ;;  %v274_v35 = vadd.f32 %v976_v58, %v992_v12  ;;  %v417_v60 = vmul.f32 %v1073_v30, %v1073_v30 }
 0x14a   :  { %v376_v55 = vadd.f32 %v375_v42, %v1060_v24  ;;  %v445_v37 = vadd.f32 %v444_v41, %v414_v25  ;;  %v1077_v29 = vmax.f32 %v258_v32, 0.0  ;;  %v279_v41 = vadd.f32 %v974_v57, %v976_v58  ;;  %v305_v21 = vpop.f32.mrf.mxu1 }
 0x14b   :  { %v1090_v32 = vmax.f32 %v271_v52, 0.0  ;;  %v282_v42 = vadd.f32 %v982_v0, %v976_v58  ;;  %v1097_v12 = vmax.f32 %v274_v35, 0.0  ;;  %v287_v0 = vadd.f32 %v976_v58, %v1023_v23 }
 0x14c   :  { %v446_v9 = vadd.f32 %v445_v37, %v415_v54  ;;  %v377_v2 = vadd.f32 %v376_v55, %v1077_v29  ;;  %v416_v1 = vmul.f32 %v1077_v29, %v1077_v29  ;;  %v418_v55 = vmul.f32 %v1079_v8, %v1079_v8  ;;  %v716_v20 = vpop.f32.mrf.mxu1 }
 0x14d   :  { %v1100_v37 = vmax.f32 %v279_v41, 0.0  ;;  %v419_v52 = vmul.f32 %v1090_v32, %v1090_v32  ;;  %v420_v35 = vmul.f32 %v1097_v12, %v1097_v12  ;;  %v290_v41 = vadd.f32 %v976_v58, %v289_v47 }
 0x14e   :  { %v378_v33 = vadd.f32 %v377_v2, %v1073_v30  ;;  %v447_v25 = vadd.f32 %v446_v9, %v416_v1  ;;  %v1107_v1 = vmax.f32 %v282_v42, 0.0  ;;  %v1118_v42 = vmax.f32 %v287_v0, 0.0  ;;  %v318_v18 = vpop.f32.mrf.mxu1 }
 0x150   :  { %v448_v54 = vadd.f32 %v447_v25, %v417_v60  ;;  %v379_v57 = vadd.f32 %v378_v33, %v1079_v8  ;;  %v295_v25 = vadd.f32 %v1009_v49, %v976_v58  ;;  %v423_v0 = vmul.f32 %v1118_v42, %v1118_v42 }
 0x152   :  { %v380_v2 = vadd.f32 %v379_v57, %v1090_v32  ;;  %v449_v9 = vadd.f32 %v448_v54, %v418_v55  ;;  %v421_v55 = vmul.f32 %v1100_v37, %v1100_v37  ;;  %v298_v57 = vadd.f32 %v1035_v59, %v976_v58 }
 0x153   :  { %v1127_v49 = vmax.f32 %v295_v25, 0.0  ;;  %v306_v25 = vadd.f32 %v976_v58, %v305_v21 }
 0x154   :  { %v381_v60 = vadd.f32 %v380_v2, %v1097_v12  ;;  %v450_v33 = vadd.f32 %v449_v9, %v419_v52  ;;  %v422_v52 = vmul.f32 %v1107_v1, %v1107_v1  ;;  %v1125_v9 = vmax.f32 %v290_v41, 0.0 }
 0x155   :  { %v1133_v59 = vmax.f32 %v298_v57, 0.0 }
 0x156   :  { %v382_v54 = vadd.f32 %v381_v60, %v1100_v37  ;;  %v451_v23 = vadd.f32 %v450_v33, %v420_v35  ;;  %v303_v35 = vadd.f32 %v976_v58, %v302_v56  ;;  %v424_v41 = vmul.f32 %v1125_v9, %v1125_v9 }
 0x158   :  { %v452_v2 = vadd.f32 %v451_v23, %v421_v55  ;;  %v383_v47 = vadd.f32 %v382_v54, %v1107_v1  ;;  %v311_v54 = vadd.f32 %v1062_v62, %v976_v58  ;;  %v717_v23 = vpop.f32.mrf.mxu1  ;;  %v1144_v57 = vmax.f32 %v303_v35, 0.0 }
 0x15a   :  { %v384_v17 = vadd.f32 %v383_v47, %v1118_v42  ;;  %v453_v60 = vadd.f32 %v452_v2, %v422_v52  ;;  %v425_v47 = vmul.f32 %v1127_v49, %v1127_v49  ;;  %v314_v2 = vadd.f32 %v713_v36, %v976_v58  ;;  %v321_v7 = vpop.f32.mrf.mxu1 }
 0x15b   :  { %v1152_v62 = vmax.f32 %v311_v54, 0.0  ;;  %v322_v54 = vadd.f32 %v976_v58, %v321_v7 }
 0x15c   :  { %v454_v33 = vadd.f32 %v453_v60, %v423_v0  ;;  %v385_v55 = vadd.f32 %v384_v17, %v1125_v9  ;;  %v426_v17 = vmul.f32 %v1133_v59, %v1133_v59  ;;  %v1150_v60 = vmax.f32 %v306_v25, 0.0 }
 0x15d   :  { %v1158_v36 = vmax.f32 %v314_v2, 0.0 }
 0x15e   :  { %v386_v52 = vadd.f32 %v385_v55, %v1127_v49  ;;  %v455_v56 = vadd.f32 %v454_v33, %v424_v41  ;;  %v427_v33 = vmul.f32 %v1144_v57, %v1144_v57  ;;  %v319_v55 = vadd.f32 %v976_v58, %v318_v18 }
 0x15f   :  { %v428_v25 = vmul.f32 %v1150_v60, %v1150_v60  ;;  %v430_v18 = vmul.f32 %v1158_v36, %v1158_v36 }
 0x160   :  { %v456_v0 = vadd.f32 %v455_v56, %v425_v47  ;;  %v387_v21 = vadd.f32 %v386_v52, %v1133_v59  ;;  %v429_v52 = vmul.f32 %v1152_v62, %v1152_v62 }
 0x162   :  { %v388_v6 = vadd.f32 %v387_v21, %v1144_v57  ;;  %v457_v35 = vadd.f32 %v456_v0, %v426_v17  ;;  %v327_v17 = vadd.f32 %v716_v20, %v976_v58  ;;  %v1168_v0 = vmax.f32 %v319_v55, 0.0 }
 0x164   :  { %v458_v41 = vadd.f32 %v457_v35, %v427_v33  ;;  %v389_v47 = vadd.f32 %v388_v6, %v1150_v60  ;;  %v330_v33 = vadd.f32 %v717_v23, %v976_v58  ;;  %v362_v35 = vmax.f32 %v322_v54, 0.0 }
 0x165   :  { %v1174_v7 = vmax.f32 %v327_v17, 0.0 }
 0x166   :  { %v390_v56 = vadd.f32 %v389_v47, %v1152_v62  ;;  %v459_v21 = vadd.f32 %v458_v41, %v428_v25  ;;  %v431_v41 = vmul.f32 %v1168_v0, %v1168_v0  ;;  %v1179_v55 = vmax.f32 %v330_v33, 0.0 }
 0x167   :  { %v432_v50 = vmul.f32 %v362_v35, %v362_v35 }
 0x168   :  { %v460_v2 = vadd.f32 %v459_v21, %v429_v52  ;;  %v391_v6 = vadd.f32 %v390_v56, %v1158_v36  ;;  %v433_v52 = vmul.f32 %v1174_v7, %v1174_v7  ;;  %v434_v23 = vmul.f32 %v1179_v55, %v1179_v55 }
 0x16a   :  { %v392_v51 = vadd.f32 %v391_v6, %v1168_v0  ;;  %v461_v47 = vadd.f32 %v460_v2, %v430_v18 }
 0x16c   :  { %v462_v20 = vadd.f32 %v461_v47, %v431_v41  ;;  %v393_v25 = vadd.f32 %v392_v51, %v362_v35 }
 0x16e   :  { %v394_v56 = vadd.f32 %v393_v25, %v1174_v7  ;;  %v463_v58 = vadd.f32 %v462_v20, %v432_v50 }
 0x170   :  { %v395_v54 = vadd.f32 %v394_v56, %v1179_v55  ;;  %v464_v21 = vadd.f32 %v463_v58, %v433_v52  ;;  %v483_v52 = vlaneseq }
 0x172   :  { %v396_v17 = vrot.slane %v395_v54, 4  ;;  %v465_v6 = vadd.f32 %v464_v21, %v434_v23  ;;  %v484_v58 = vshrl.u32 %v483_v52, 7  ;;  %v476_v23 = vld [vmem:[#allocation7 + $0x1] sm:$0x1]  ;;  %v1344_v52 = vld [vmem:[#allocation22_spill] sm:$0xff] }
 0x174   :  { %v397_v18 = vadd.f32 %v396_v17, %v395_v54  ;;  %v466_v2 = vrot.slane %v465_v6, 4  ;;  %v485_v54 = vsub.s32 0, %v484_v58  ;;  %v1345_v58 = vld [vmem:[#allocation25_spill] sm:$0xff] }
 0x176   :  { %v398_v33 = vrot.slane %v397_v18, 2  ;;  %v467_v41 = vadd.f32 %v466_v2, %v465_v6  ;;  %v480_v6 = vld [vmem:[#allocation7 + $0x2] sm:$0x1] }
 0x178   :  { %v399_v51 = vadd.f32 %v398_v33, %v397_v18  ;;  %v468_v47 = vrot.slane %v467_v41, 2 }
 0x17a   :  { %v400_v43 = vrot.slane %v399_v51, 1  ;;  %v469_v40 = vadd.f32 %v468_v47, %v467_v41 }
 0x17c   :  { %v401_v39 = vadd.f32 %v400_v43, %v399_v51  ;;  %v470_v38 = vrot.slane %v469_v40, 1 }
 0x17e   :  { %v402_v25 = vmul.f32 0.00390625, %v401_v39  ;;  %v471_v50 = vadd.f32 %v470_v38, %v469_v40 }
 0x180   :  { %v472_v20 = vmul.f32 0.00390625, %v471_v50  ;;  %v473_v31 = vmul.f32 %v402_v25, %v402_v25 }
 0x182   :  { %v474_v28 = vsub.f32 %v472_v20, %v473_v31  ;;  %v1342_v20 = vld [vmem:[#allocation18_spill] sm:$0xff] }
 0x184   :  { %v475_v27 = vmax.f32 %v474_v28, 0.0 }
 0x186   :  { %v477_v56 = vadd.f32 1e-05, %v475_v27 }
 0x188   :  { %750 = vrsqrt.f32 %v477_v56  ;;  %v1343_v56 = vld [vmem:[#allocation19_spill] sm:$0xff] }
 0x195   :  { %v751_v21 = vpop.eup %750 }
 0x196   :  { %v479_v17 = vmul.f32 %v751_v21, %v476_v23  ;;  %v1346_v23 = vld [vmem:[#allocation26_spill] sm:$0xff] }
 0x197   :  { %v1348_v21 = vld [vmem:[#allocation30_spill] sm:$0xff] }
 0x198   :  { %v481_v18 = vmul.f32 %v479_v17, %v402_v25  ;;  %v486_v2 = vrot.slane %v479_v17, %v485_v54  ;;  %v1349_v17 = vld [vmem:[#allocation32_spill] sm:$0xff] }
 0x19a   :  { %v482_v33 = vsub.f32 %v480_v6, %v481_v18  ;;  %v516_v43 = vmul.f32 %v486_v2, %v362_v35  ;;  %v487_v39 = vmul.f32 %v486_v2, %v985_v5  ;;  %v488_v38 = vmul.f32 %v486_v2, %v990_v11  ;;  %v1350_v6 = vld [vmem:[#allocation33_spill] sm:$0xff]  ;;  %v1351_v18 = vld [vmem:[#allocation12_spill] sm:$0xff] }
 0x19b   :  { %v489_v31 = vmul.f32 %v486_v2, %v988_v10  ;;  %v490_v27 = vmul.f32 %v486_v2, %v994_v13  ;;  %v491_v28 = vmul.f32 %v486_v2, %v1007_v48  ;;  %v492_v40 = vmul.f32 %v486_v2, %v1021_v22 }
 0x19c   :  { %v548_v41 = vadd.f32 %v516_v43, %v952_v45  ;;  %v1194_v51 = vrot.slane %v482_v33, %v485_v54  ;;  %v493_v47 = vmul.f32 %v486_v2, %v1016_v63  ;;  %v494_v35 = vmul.f32 %v486_v2, %v1025_v34  ;;  %v1347_v54 = vld [vmem:[#allocation27_spill] sm:$0xff]  ;;  %v1353_v43 = vld [vmem:[#allocation14_spill] sm:$0xff] }
 0x19d   :  { %v495_v5 = vmul.f32 %v486_v2, %v1037_v61  ;;  %v496_v11 = vmul.f32 %v486_v2, %v1049_v46  ;;  %v497_v10 = vmul.f32 %v486_v2, %v1044_v53  ;;  %v498_v13 = vmul.f32 %v486_v2, %v1051_v44 }
 0x19e   :  { %v584_v48 = vadd.f32 %v1194_v51, %v548_v41  ;;  %v499_v22 = vmul.f32 %v486_v2, %v1060_v24  ;;  %v500_v45 = vmul.f32 %v486_v2, %v1077_v29  ;;  %v501_v25 = vmul.f32 %v486_v2, %v1073_v30 }
 0x19f   :  { %v502_v63 = vmul.f32 %v486_v2, %v1079_v8  ;;  %v503_v34 = vmul.f32 %v486_v2, %v1090_v32  ;;  %v504_v61 = vmul.f32 %v486_v2, %v1097_v12  ;;  %v505_v46 = vmul.f32 %v486_v2, %v1100_v37 }
 0x1a0   :  { %616 = vst [vmem:[#allocation8 + $0xe8] sm:$0xff] %v584_v48  ;;  %v506_v53 = vmul.f32 %v486_v2, %v1107_v1  ;;  %v507_v44 = vmul.f32 %v486_v2, %v1118_v42  ;;  %v508_v50 = vmul.f32 %v486_v2, %v1125_v9  ;;  %v509_v24 = vmul.f32 %v486_v2, %v1127_v49  ;;  %v1360_v48 = vld [vmem:[#allocation24_spill] sm:$0xff] }
 0x1a1   :  { %v510_v29 = vmul.f32 %v486_v2, %v1133_v59  ;;  %v511_v30 = vmul.f32 %v486_v2, %v1144_v57  ;;  %v512_v8 = vmul.f32 %v486_v2, %v1150_v60  ;;  %v513_v32 = vmul.f32 %v486_v2, %v1152_v62 }
 0x1a2   :  { %v514_v12 = vmul.f32 %v486_v2, %v1158_v36  ;;  %v515_v37 = vmul.f32 %v486_v2, %v1168_v0  ;;  %v517_v1 = vmul.f32 %v486_v2, %v1174_v7  ;;  %v518_v42 = vmul.f32 %v486_v2, %v1179_v55  ;;  %v1352_v2 = vld [vmem:[#allocation13_spill] sm:$0xff] }
 0x1a3   :  { %v519_v9 = vadd.f32 %v487_v39, %v878_v3  ;;  %v520_v49 = vadd.f32 %v488_v38, %v880_v4  ;;  %v521_v59 = vadd.f32 %v489_v31, %v890_v14  ;;  %v522_v57 = vadd.f32 %v490_v27, %v892_v15  ;;  %v1354_v38 = vld [vmem:[#allocation15_spill] sm:$0xff]  ;;  %v1355_v27 = vld [vmem:[#allocation16_spill] sm:$0xff] }
 0x1a4   :  { %v523_v60 = vadd.f32 %v491_v28, %v894_v16  ;;  %v524_v62 = vadd.f32 %v492_v40, %v900_v19  ;;  %v525_v36 = vadd.f32 %v493_v47, %v914_v26  ;;  %v526_v0 = vadd.f32 %v494_v35, %v1342_v20  ;;  %v1356_v40 = vld [vmem:[#allocation17_spill] sm:$0xff]  ;;  %v1357_v47 = vld [vmem:[#allocation20_spill] sm:$0xff]  ;;  %v1364_v20 = vld [vmem:[#allocation34_spill] sm:$0xff] }
 0x1a5   :  { %v527_v7 = vadd.f32 %v495_v5, %v1343_v56  ;;  %v528_v55 = vadd.f32 %v496_v11, %v1344_v52  ;;  %v529_v3 = vadd.f32 %v497_v10, %v1345_v58  ;;  %v530_v4 = vadd.f32 %v498_v13, %v1346_v23  ;;  %v1358_v5 = vld [vmem:[#allocation21_spill] sm:$0xff]  ;;  %v1359_v10 = vld [vmem:[#allocation23_spill] sm:$0xff] }
 0x1a6   :  { %v531_v14 = vadd.f32 %v499_v22, %v1347_v54  ;;  %v532_v15 = vadd.f32 %v500_v45, %v1348_v21  ;;  %v533_v16 = vadd.f32 %v501_v25, %v1349_v17  ;;  %v534_v19 = vadd.f32 %v502_v63, %v1350_v6  ;;  %v1361_v45 = vld [vmem:[#allocation28_spill] sm:$0xff]  ;;  %v1362_v63 = vld [vmem:[#allocation29_spill] sm:$0xff]  ;;  %v1365_v56 = vld [vmem:[#allocation35_spill] sm:$0xff] }
 0x1a7   :  { %v535_v26 = vadd.f32 %v503_v34, %v1351_v18  ;;  %v536_v33 = vadd.f32 %v504_v61, %v1352_v2  ;;  %v537_v39 = vadd.f32 %v505_v46, %v1353_v43  ;;  %v538_v31 = vadd.f32 %v506_v53, %v1354_v38  ;;  %v1363_v61 = vld [vmem:[#allocation31_spill] sm:$0xff] }
 0x1a8   :  { %v539_v28 = vadd.f32 %v507_v44, %v1355_v27  ;;  %v540_v41 = vadd.f32 %v508_v50, %v1356_v40  ;;  %v541_v35 = vadd.f32 %v509_v24, %v1357_v47  ;;  %v542_v11 = vadd.f32 %v510_v29, %v1358_v5 }
 0x1a9   :  { %v543_v13 = vadd.f32 %v511_v30, %v1359_v10  ;;  %v544_v22 = vadd.f32 %v512_v8, %v1360_v48  ;;  %v545_v25 = vadd.f32 %v513_v32, %v1361_v45  ;;  %v546_v34 = vadd.f32 %v514_v12, %v1362_v63 }
 0x1aa   :  { %v547_v46 = vadd.f32 %v515_v37, %v1363_v61  ;;  %v549_v53 = vadd.f32 %v517_v1, %v1364_v20  ;;  %v550_v44 = vadd.f32 %v518_v42, %v1365_v56  ;;  %v555_v50 = vadd.f32 %v1194_v51, %v519_v9 }
 0x1ab   :  { %v556_v24 = vadd.f32 %v1194_v51, %v520_v49  ;;  %v557_v29 = vadd.f32 %v1194_v51, %v521_v59  ;;  %v558_v30 = vadd.f32 %v1194_v51, %v522_v57  ;;  %v559_v8 = vadd.f32 %v1194_v51, %v523_v60 }
 0x1ac   :  { %v560_v32 = vadd.f32 %v1194_v51, %v524_v62  ;;  %v561_v12 = vadd.f32 %v1194_v51, %v525_v36  ;;  %v562_v37 = vadd.f32 %v1194_v51, %v526_v0  ;;  %v563_v1 = vadd.f32 %v1194_v51, %v527_v7  ;;  %587 = vst [vmem:[#allocation8] sm:$0xff] %v555_v50 }
 0x1ad   :  { %v564_v42 = vadd.f32 %v1194_v51, %v528_v55  ;;  %v565_v9 = vadd.f32 %v1194_v51, %v529_v3  ;;  %v566_v49 = vadd.f32 %v1194_v51, %v530_v4  ;;  %v567_v59 = vadd.f32 %v1194_v51, %v531_v14  ;;  %588 = vst [vmem:[#allocation8 + $0x8] sm:$0xff] %v556_v24 }
 0x1ae   :  { %589 = vst [vmem:[#allocation8 + $0x10] sm:$0xff] %v557_v29  ;;  %590 = vst [vmem:[#allocation8 + $0x18] sm:$0xff] %v558_v30  ;;  %v568_v57 = vadd.f32 %v1194_v51, %v532_v15  ;;  %v569_v60 = vadd.f32 %v1194_v51, %v533_v16  ;;  %v570_v62 = vadd.f32 %v1194_v51, %v534_v19 }
 0x1af   :  { %591 = vst [vmem:[#allocation8 + $0x20] sm:$0xff] %v559_v8  ;;  %v571_v36 = vadd.f32 %v1194_v51, %v535_v26  ;;  %592 = vst [vmem:[#allocation8 + $0x28] sm:$0xff] %v560_v32  ;;  %v572_v0 = vadd.f32 %v1194_v51, %v536_v33  ;;  %v573_v7 = vadd.f32 %v1194_v51, %v537_v39 }
 0x1b0   :  { %593 = vst [vmem:[#allocation8 + $0x30] sm:$0xff] %v561_v12  ;;  %594 = vst [vmem:[#allocation8 + $0x38] sm:$0xff] %v562_v37  ;;  %v574_v52 = vadd.f32 %v1194_v51, %v538_v31  ;;  %v575_v55 = vadd.f32 %v1194_v51, %v539_v28  ;;  %v576_v58 = vadd.f32 %v1194_v51, %v540_v41 }
 0x1b1   :  { %595 = vst [vmem:[#allocation8 + $0x40] sm:$0xff] %v563_v1  ;;  %596 = vst [vmem:[#allocation8 + $0x48] sm:$0xff] %v564_v42  ;;  %v577_v3 = vadd.f32 %v1194_v51, %v541_v35  ;;  %v578_v23 = vadd.f32 %v1194_v51, %v542_v11  ;;  %v579_v4 = vadd.f32 %v1194_v51, %v543_v13 }
 0x1b2   :  { %597 = vst [vmem:[#allocation8 + $0x50] sm:$0xff] %v565_v9  ;;  %598 = vst [vmem:[#allocation8 + $0x58] sm:$0xff] %v566_v49  ;;  %v580_v54 = vadd.f32 %v1194_v51, %v544_v22  ;;  %v581_v14 = vadd.f32 %v1194_v51, %v545_v25  ;;  %v582_v21 = vadd.f32 %v1194_v51, %v546_v34 }
 0x1b3   :  { %599 = vst [vmem:[#allocation8 + $0x60] sm:$0xff] %v567_v59  ;;  %600 = vst [vmem:[#allocation8 + $0x68] sm:$0xff] %v568_v57  ;;  %v583_v15 = vadd.f32 %v1194_v51, %v547_v46  ;;  %v585_v17 = vadd.f32 %v1194_v51, %v549_v53  ;;  %v586_v16 = vadd.f32 %v1194_v51, %v550_v44 }
 0x1b4   :  { %601 = vst [vmem:[#allocation8 + $0x70] sm:$0xff] %v569_v60  ;;  %602 = vst [vmem:[#allocation8 + $0x78] sm:$0xff] %v570_v62 }
 0x1b5   :  { %603 = vst [vmem:[#allocation8 + $0x80] sm:$0xff] %v571_v36  ;;  %604 = vst [vmem:[#allocation8 + $0x88] sm:$0xff] %v572_v0 }
 0x1b6   :  { %605 = vst [vmem:[#allocation8 + $0x90] sm:$0xff] %v573_v7  ;;  %606 = vst [vmem:[#allocation8 + $0x98] sm:$0xff] %v574_v52 }
 0x1b7   :  { %607 = vst [vmem:[#allocation8 + $0xa0] sm:$0xff] %v575_v55  ;;  %608 = vst [vmem:[#allocation8 + $0xa8] sm:$0xff] %v576_v58 }
 0x1b8   :  { %609 = vst [vmem:[#allocation8 + $0xb0] sm:$0xff] %v577_v3  ;;  %610 = vst [vmem:[#allocation8 + $0xb8] sm:$0xff] %v578_v23 }
 0x1b9   :  { %611 = vst [vmem:[#allocation8 + $0xc0] sm:$0xff] %v579_v4  ;;  %612 = vst [vmem:[#allocation8 + $0xc8] sm:$0xff] %v580_v54 }
 0x1ba   :  { %613 = vst [vmem:[#allocation8 + $0xd0] sm:$0xff] %v581_v14  ;;  %614 = vst [vmem:[#allocation8 + $0xd8] sm:$0xff] %v582_v21 }
 0x1bb   :  { %615 = vst [vmem:[#allocation8 + $0xe0] sm:$0xff] %v583_v15  ;;  %617 = vst [vmem:[#allocation8 + $0xf0] sm:$0xff] %v585_v17 }
 0x1bc   :  { %618 = vst [vmem:[#allocation8 + $0xf8] sm:$0xff] %v586_v16 }
 0x1bd   :  { %823 = shalt.err (!%p820_p5)
}
 0x1be   :  { %630 = dma.vmem_to_hbm [thread:$0]  %s625_s2, 4096, %s1293_s3, [#allocation4], %s842_s22, %s842_s22, %s843_s23  }
 0x1bf   :  { %836 = dma.done.wait [#allocation4], 4096  }
 0x1c0   :  { %837 = vsyncadd [#allocation4], 4294963200 }
 0x1c1   :  { %634 = vsyncpa [#allocation3], 1 }
 0x1c2   :  { %635 = vsyncpa [#allocation6], 1 }
 0x1c3   :  { %636 = vsyncpa [#allocation4], 1 }

</bundles_post_ra>
